<compile_context>
chip_gen: v6e
topology: v6e:2x2x1
jax: 0.10.0
libtpu: 0.0.40
codegen_flags: <defaults>
</compile_context>

<pallas_src>
import numpy as np
import jax
import jax.numpy as jnp
from jax.experimental import pallas as pl
from jax.experimental.pallas import tpu as pltpu


def _build_waves(src, tgt, pad_node):
    """Group ordered edges into waves.

    Within a wave no edge's source node is the target of an earlier edge of the
    same wave, so every in-wave source read sees the pre-wave state and the
    propagation stays exactly equivalent to the sequential reference. Waves are
    padded to a common width with dummy edges that point at an all-zero pad row.
    """
    waves, cur, cur_tgts = [], [], set()
    for s, t in zip(src.tolist(), tgt.tolist()):
        if s in cur_tgts:
            waves.append(cur)
            cur, cur_tgts = [], set()
        cur.append((s, t))
        cur_tgts.add(t)
    if cur:
        waves.append(cur)
    if not waves:  # no edges: a single all-dummy wave (no-op on real rows)
        waves = [[(pad_node, pad_node)]]
    wave_w = max(len(w) for w in waves)
    ws, wt = [], []
    for wave in waves:
        for (s, t) in wave:
            ws.append(s)
            wt.append(t)
        ws.extend([pad_node] * (wave_w - len(wave)))
        wt.extend([pad_node] * (wave_w - len(wave)))
    return (np.asarray(ws, np.int32), np.asarray(wt, np.int32),
            len(waves), wave_w)


def _make_kernel(n_waves, wave_w, unroll):
    def kernel(src_ref, tgt_ref, fdlast_ref, feats_hbm, wt_hbm, out_ref,
               work_ref, wt_ref, wave_buf, sems):
        Np, D = work_ref.shape

        # Stream the padded/transposed Layer weight HBM->VMEM; overlap the DMA
        # with the edge-wave loop, wait only right before the matmul.
        wt_copy = pltpu.make_async_copy(wt_hbm, wt_ref, sems.at[0])
        wt_copy.start()
        # DMA raw features straight into the mutable propagation buffer
        # (no duplicate VMEM feature buffer, no VMEM->VMEM copy).
        feat_copy = pltpu.make_async_copy(feats_hbm, work_ref, sems.at[1])
        feat_copy.start()
        feat_copy.wait()

        def wave_body(wv, carry):
            base = wv * wave_w
            # Gather this wave's source rows (all reads see pre-wave state).
            for w in range(wave_w):
                s = src_ref[base + w]
                wave_buf[w:w + 1, :] = work_ref[pl.ds(s, 1), :]
            rows = wave_buf[...]
            # One batched L2 normalize for the whole wave: a single (W, D) XLU
            # lane reduce + a single EUP rsqrt (F.normalize eps folded onto
            # sumsq as eps^2 so zero rows stay zero).
            sumsq = jnp.sum(rows * rows, axis=1, keepdims=True)
            normed = rows * jax.lax.rsqrt(jnp.maximum(sumsq, 1e-24))
            # Ordered scatter-add -> exact sequential semantics, including
            # duplicate targets inside a wave.
            # TODO(synk): for very wide waves this could become a one-hot
            # (Np, W) @ (W, D) MXU matmul instead of W row updates.
            for w in range(wave_w):
                t = tgt_ref[base + w]
                work_ref[pl.ds(t, 1), :] = (work_ref[pl.ds(t, 1), :]
                                            + normed[w:w + 1, :])
            return carry

        jax.lax.fori_loop(0, n_waves, wave_body, 0, unroll=unroll)

        # feat_dict differs from the propagated self_feats only in its last
        # column; that column's final value (raw[:, -1] + segment-sum of time
        # fractions over targets) is edge-metadata-only and was precomputed in
        # the wrapper.
        lastcol = jax.lax.broadcasted_iota(jnp.int32, (Np, D), 1) == (D - 1)
        fd = jnp.where(lastcol, fdlast_ref[...], work_ref[...])

        # Layer: weight.mm(x.t()).t() == x @ weight.T ; then tanh over the stack.
        wt_copy.wait()
        out_ref[...] = jnp.tanh(
            jnp.dot(fd, wt_ref[...], preferred_element_type=jnp.float32)
        ).astype(out_ref.dtype)

    return kernel


def tpgcn_forward(raw_features, edge_src, edge_tgt, edge_tfrac, weight):
    """raw_features: (N, D) f32; weight: (O, D) f32; edge_*: (E,) static edges."""
    raw_features = jnp.asarray(raw_features, jnp.float32)
    weight = jnp.asarray(weight, jnp.float32)
    N, D = raw_features.shape
    O = weight.shape[0]
    O_pad = ((O + 127) // 128) * 128

    # Edge structure is static (a Python dict in the torch model); materialize
    # host-side to build waves and the feature-independent last-column sums.
    src_np = np.asarray(edge_src, np.int32)
    tgt_np = np.asarray(edge_tgt, np.int32)
    tf_np = np.asarray(edge_tfrac, np.float64)

    Np = N + 1  # +1 all-zero pad row; dummy (padding) edges point at it
    wave_src, wave_tgt, n_waves, wave_w = _build_waves(src_np, tgt_np, N)

    # Hoisted out of the kernel: fd[:, -1] = raw[:, -1] + sum over edges
    # targeting node n of (time + 1) / all_time.
    tsum = np.zeros((N,), np.float64)
    np.add.at(tsum, tgt_np, tf_np)
    fd_last = jnp.zeros((Np, 1), jnp.float32).at[:N, 0].set(
        raw_features[:, -1] + jnp.asarray(tsum, jnp.float32))

    feats_p = jnp.zeros((Np, D), jnp.float32).at[:N].set(raw_features)
    # Lane-dense weight^T / output (unmasked vst); padding sliced off outside.
    wt = jnp.zeros((D, O_pad), dtype=jnp.float32).at[:, :O].set(weight.T)

    kernel = _make_kernel(n_waves, wave_w, unroll=(n_waves <= 32))
    out_padded = pl.pallas_call(
        kernel,
        out_shape=jax.ShapeDtypeStruct((Np, O_pad), jnp.float32),
        in_specs=[
            pl.BlockSpec(memory_space=pltpu.MemorySpace.SMEM),  # wave sources
            pl.BlockSpec(memory_space=pltpu.MemorySpace.SMEM),  # wave targets
            pl.BlockSpec(memory_space=pltpu.MemorySpace.VMEM),  # fd last col (Np,1)
            pl.BlockSpec(memory_space=pl.ANY),                  # features (HBM)
            pl.BlockSpec(memory_space=pl.ANY),                  # weight^T padded (HBM)
        ],
        out_specs=pl.BlockSpec(memory_space=pltpu.MemorySpace.VMEM),
        scratch_shapes=[
            pltpu.VMEM((Np, D), jnp.float32),       # mutable self_feats buffer
            pltpu.VMEM((D, O_pad), jnp.float32),    # streamed weight^T
            pltpu.VMEM((wave_w, D), jnp.float32),   # per-wave source-row gather
            pltpu.SemaphoreType.DMA((2,)),          # weight / feature DMA sems
        ],
        compiler_params=pltpu.CompilerParams(
            vmem_limit_bytes=32 * 1024 * 1024),
    )(jnp.asarray(wave_src), jnp.asarray(wave_tgt), fd_last, feats_p, wt)
    return out_padded[:N, :O]


def reference_forward(feats, src, tgt, tfrac, weight):
    """Pure-numpy replica of Model.forward with flag='node'."""
    feats = np.asarray(feats, dtype=np.float64)
    weight = np.asarray(weight, dtype=np.float64)
    work = feats.copy()
    fd = feats.copy()
    for e in range(len(src)):
        s, t = int(src[e]), int(tgt[e])
        row = work[s].copy()
        nrm = np.sqrt(np.sum(row * row))
        normed = row / max(nrm, 1e-12)
        work[t] = work[t] + normed
        result = normed.copy()
        result[-1] = float(tfrac[e])
        fd[t] = fd[t] + result
    return np.tanh(fd @ weight.T).astype(np.float32)


if __name__ == "__main__":
    key = jax.random.PRNGKey(0)
    N, D, O = 8, 32, 16  # nodes, input_size, out_size
    k1, k2 = jax.random.split(key)

    raw_features = jax.random.normal(k1, (N, D), dtype=jnp.float32)

    # Layer weight (out_size, input_size), xavier_uniform_ init (deterministic).
    bound = float(np.sqrt(6.0 / (D + O)))
    weight = jax.random.uniform(k2, (O, D), minval=-bound, maxval=bound,
                                dtype=jnp.float32)

    # dict_edge = {time: [(src, tgt), ...]} ; all_time = last time key + 1
    dict_edge = {
        0: [(0, 1), (2, 3), (4, 5)],
        1: [(1, 2), (3, 4), (6, 7)],
        2: [(5, 6), (7, 0), (0, 2), (3, 1)],
    }
    all_time = list(dict_edge.keys())[-1] + 1
    src, tgt, tfrac = [], [], []
    for time, edges in dict_edge.items():
        for (s, t) in edges:
            src.append(s)
            tgt.append(t)
            tfrac.append((time + 1) / all_time)
    edge_src = jnp.asarray(src, dtype=jnp.int32)
    edge_tgt = jnp.asarray(tgt, dtype=jnp.int32)
    edge_tfrac = jnp.asarray(tfrac, dtype=jnp.float32)

    out = tpgcn_forward(raw_features, edge_src, edge_tgt, edge_tfrac, weight)
    out = jax.block_until_ready(out)

    ref = reference_forward(np.asarray(raw_features), np.asarray(edge_src),
                            np.asarray(edge_tgt), np.asarray(edge_tfrac),
                            np.asarray(weight))
    assert out.shape == (N, O)
    assert np.allclose(np.asarray(out), ref, rtol=1e-4, atol=1e-4), "mismatch vs reference"
    print("KERNEL_OK")
</pallas_src>

<mosaic_0001>
module attributes {stable_mosaic.version = 11 : i64} {
  func.func @kernel(%arg0: memref<16xi32, #tpu.memory_space<smem>>, %arg1: memref<16xi32, #tpu.memory_space<smem>>, %arg2: memref<9x1xf32, #tpu.memory_space<vmem>>, %arg3: memref<9x32xf32, #tpu.memory_space<any>>, %arg4: memref<32x128xf32, #tpu.memory_space<any>>, %arg5: memref<9x128xf32, #tpu.memory_space<vmem>>, %arg6: memref<9x32xf32, #tpu.memory_space<vmem>>, %arg7: memref<32x128xf32, #tpu.memory_space<vmem>>, %arg8: memref<4x32xf32, #tpu.memory_space<vmem>>, %arg9: memref<2x!tpu.dma_semaphore, #tpu.memory_space<semaphore_mem>>) attributes {dimension_semantics = [], scalar_prefetch = 0 : i64, scratch_operands = 4 : i64, tpu.core_type = #tpu.core_type<tc>} {
    %c0_i32 = arith.constant 0 : i32
    %0 = tpu.memref_slice %arg9[%c0_i32] : memref<2x!tpu.dma_semaphore, #tpu.memory_space<semaphore_mem>> -> memref<1x!tpu.dma_semaphore, #tpu.memory_space<semaphore_mem>>
    %1 = tpu.memref_squeeze %0 : memref<1x!tpu.dma_semaphore, #tpu.memory_space<semaphore_mem>> -> memref<!tpu.dma_semaphore, #tpu.memory_space<semaphore_mem>>
    tpu.enqueue_dma source(%arg4 : memref<32x128xf32, #tpu.memory_space<any>>) target(%arg7 : memref<32x128xf32, #tpu.memory_space<vmem>>) target_semaphore(%1 : memref<!tpu.dma_semaphore, #tpu.memory_space<semaphore_mem>>)
    %c1_i32 = arith.constant 1 : i32
    %2 = tpu.memref_slice %arg9[%c1_i32] : memref<2x!tpu.dma_semaphore, #tpu.memory_space<semaphore_mem>> -> memref<1x!tpu.dma_semaphore, #tpu.memory_space<semaphore_mem>>
    %3 = tpu.memref_squeeze %2 : memref<1x!tpu.dma_semaphore, #tpu.memory_space<semaphore_mem>> -> memref<!tpu.dma_semaphore, #tpu.memory_space<semaphore_mem>>
    tpu.enqueue_dma source(%arg3 : memref<9x32xf32, #tpu.memory_space<any>>) target(%arg6 : memref<9x32xf32, #tpu.memory_space<vmem>>) target_semaphore(%3 : memref<!tpu.dma_semaphore, #tpu.memory_space<semaphore_mem>>)
    %c1_i32_0 = arith.constant 1 : i32
    %4 = tpu.memref_slice %arg9[%c1_i32_0] : memref<2x!tpu.dma_semaphore, #tpu.memory_space<semaphore_mem>> -> memref<1x!tpu.dma_semaphore, #tpu.memory_space<semaphore_mem>>
    %5 = tpu.memref_squeeze %4 : memref<1x!tpu.dma_semaphore, #tpu.memory_space<semaphore_mem>> -> memref<!tpu.dma_semaphore, #tpu.memory_space<semaphore_mem>>
    tpu.wait_dma2 semaphore(%5 : memref<!tpu.dma_semaphore, #tpu.memory_space<semaphore_mem>>) src(%arg3 : memref<9x32xf32, #tpu.memory_space<any>>) dst(%arg6 : memref<9x32xf32, #tpu.memory_space<vmem>>)
    %c0_i32_1 = arith.constant 0 : i32
    %c4_i32 = arith.constant 4 : i32
    %6 = arith.muli %c0_i32_1, %c4_i32 : i32
    %c0_i32_2 = arith.constant 0 : i32
    %7 = arith.addi %6, %c0_i32_2 : i32
    %8 = arith.index_cast %7 : i32 to index
    %9 = memref.load %arg0[%8] : memref<16xi32, #tpu.memory_space<smem>>
    %10 = arith.index_cast %9 : i32 to index
    %c0 = arith.constant 0 : index
    %11 = vector.load %arg6[%10, %c0] : memref<9x32xf32, #tpu.memory_space<vmem>>, vector<1x32xf32>
    %c0_3 = arith.constant 0 : index
    %c0_4 = arith.constant 0 : index
    %12 = vector.load %arg8[%c0_3, %c0_4] : memref<4x32xf32, #tpu.memory_space<vmem>>, vector<1x32xf32>
    tpu.vector_store %arg8[%c0_3, %c0_4], %11 {strides = array<i32>} : memref<4x32xf32, #tpu.memory_space<vmem>>, vector<1x32xf32>,
    %c1_i32_5 = arith.constant 1 : i32
    %13 = arith.addi %6, %c1_i32_5 : i32
    %14 = arith.index_cast %13 : i32 to index
    %15 = memref.load %arg0[%14] : memref<16xi32, #tpu.memory_space<smem>>
    %16 = arith.index_cast %15 : i32 to index
    %c0_6 = arith.constant 0 : index
    %17 = vector.load %arg6[%16, %c0_6] : memref<9x32xf32, #tpu.memory_space<vmem>>, vector<1x32xf32>
    %c1 = arith.constant 1 : index
    %c0_7 = arith.constant 0 : index
    %18 = vector.load %arg8[%c1, %c0_7] : memref<4x32xf32, #tpu.memory_space<vmem>>, vector<1x32xf32>
    tpu.vector_store %arg8[%c1, %c0_7], %17 {strides = array<i32>} : memref<4x32xf32, #tpu.memory_space<vmem>>, vector<1x32xf32>,
    %c2_i32 = arith.constant 2 : i32
    %19 = arith.addi %6, %c2_i32 : i32
    %20 = arith.index_cast %19 : i32 to index
    %21 = memref.load %arg0[%20] : memref<16xi32, #tpu.memory_space<smem>>
    %22 = arith.index_cast %21 : i32 to index
    %c0_8 = arith.constant 0 : index
    %23 = vector.load %arg6[%22, %c0_8] : memref<9x32xf32, #tpu.memory_space<vmem>>, vector<1x32xf32>
    %c2 = arith.constant 2 : index
    %c0_9 = arith.constant 0 : index
    %24 = vector.load %arg8[%c2, %c0_9] : memref<4x32xf32, #tpu.memory_space<vmem>>, vector<1x32xf32>
    tpu.vector_store %arg8[%c2, %c0_9], %23 {strides = array<i32>} : memref<4x32xf32, #tpu.memory_space<vmem>>, vector<1x32xf32>,
    %c3_i32 = arith.constant 3 : i32
    %25 = arith.addi %6, %c3_i32 : i32
    %26 = arith.index_cast %25 : i32 to index
    %27 = memref.load %arg0[%26] : memref<16xi32, #tpu.memory_space<smem>>
    %28 = arith.index_cast %27 : i32 to index
    %c0_10 = arith.constant 0 : index
    %29 = vector.load %arg6[%28, %c0_10] : memref<9x32xf32, #tpu.memory_space<vmem>>, vector<1x32xf32>
    %c3 = arith.constant 3 : index
    %c0_11 = arith.constant 0 : index
    %30 = vector.load %arg8[%c3, %c0_11] : memref<4x32xf32, #tpu.memory_space<vmem>>, vector<1x32xf32>
    tpu.vector_store %arg8[%c3, %c0_11], %29 {strides = array<i32>} : memref<4x32xf32, #tpu.memory_space<vmem>>, vector<1x32xf32>,
    %c0_12 = arith.constant 0 : index
    %c0_13 = arith.constant 0 : index
    %31 = vector.load %arg8[%c0_12, %c0_13] : memref<4x32xf32, #tpu.memory_space<vmem>>, vector<4x32xf32>
    %32 = arith.mulf %31, %31 : vector<4x32xf32>
    %cst = arith.constant dense<0.000000e+00> : vector<4xf32>
    %33 = vector.multi_reduction <add>, %32, %cst [1] : vector<4x32xf32> to vector<4xf32>
    %34 = vector.shape_cast %33 : vector<4xf32> to vector<4x1xf32>
    %cst_14 = arith.constant 1.000000e-24 : f32
    %35 = vector.broadcast %cst_14 : f32 to vector<4x1xf32>
    %36 = arith.maximumf %34, %35 : vector<4x1xf32>
    %37 = math.rsqrt %36 : vector<4x1xf32>
    %38 = vector.broadcast %37 : vector<4x1xf32> to vector<4x32xf32>
    %39 = arith.mulf %31, %38 : vector<4x32xf32>
    %c0_i32_15 = arith.constant 0 : i32
    %40 = arith.addi %6, %c0_i32_15 : i32
    %41 = arith.index_cast %40 : i32 to index
    %42 = memref.load %arg1[%41] : memref<16xi32, #tpu.memory_space<smem>>
    %43 = arith.index_cast %42 : i32 to index
    %c0_16 = arith.constant 0 : index
    %44 = vector.load %arg6[%43, %c0_16] : memref<9x32xf32, #tpu.memory_space<vmem>>, vector<1x32xf32>
    %45 = vector.extract_strided_slice %39 {offsets = [0, 0], sizes = [1, 32], strides = [1, 1]} : vector<4x32xf32> to vector<1x32xf32>
    %46 = arith.addf %44, %45 : vector<1x32xf32>
    %47 = arith.index_cast %42 : i32 to index
    %c0_17 = arith.constant 0 : index
    %48 = vector.load %arg6[%47, %c0_17] : memref<9x32xf32, #tpu.memory_space<vmem>>, vector<1x32xf32>
    tpu.vector_store %arg6[%47, %c0_17], %46 {strides = array<i32>} : memref<9x32xf32, #tpu.memory_space<vmem>>, vector<1x32xf32>,
    %c1_i32_18 = arith.constant 1 : i32
    %49 = arith.addi %6, %c1_i32_18 : i32
    %50 = arith.index_cast %49 : i32 to index
    %51 = memref.load %arg1[%50] : memref<16xi32, #tpu.memory_space<smem>>
    %52 = arith.index_cast %51 : i32 to index
    %c0_19 = arith.constant 0 : index
    %53 = vector.load %arg6[%52, %c0_19] : memref<9x32xf32, #tpu.memory_space<vmem>>, vector<1x32xf32>
    %54 = vector.extract_strided_slice %39 {offsets = [1, 0], sizes = [1, 32], strides = [1, 1]} : vector<4x32xf32> to vector<1x32xf32>
    %55 = arith.addf %53, %54 : vector<1x32xf32>
    %56 = arith.index_cast %51 : i32 to index
    %c0_20 = arith.constant 0 : index
    %57 = vector.load %arg6[%56, %c0_20] : memref<9x32xf32, #tpu.memory_space<vmem>>, vector<1x32xf32>
    tpu.vector_store %arg6[%56, %c0_20], %55 {strides = array<i32>} : memref<9x32xf32, #tpu.memory_space<vmem>>, vector<1x32xf32>,
    %c2_i32_21 = arith.constant 2 : i32
    %58 = arith.addi %6, %c2_i32_21 : i32
    %59 = arith.index_cast %58 : i32 to index
    %60 = memref.load %arg1[%59] : memref<16xi32, #tpu.memory_space<smem>>
    %61 = arith.index_cast %60 : i32 to index
    %c0_22 = arith.constant 0 : index
    %62 = vector.load %arg6[%61, %c0_22] : memref<9x32xf32, #tpu.memory_space<vmem>>, vector<1x32xf32>
    %63 = vector.extract_strided_slice %39 {offsets = [2, 0], sizes = [1, 32], strides = [1, 1]} : vector<4x32xf32> to vector<1x32xf32>
    %64 = arith.addf %62, %63 : vector<1x32xf32>
    %65 = arith.index_cast %60 : i32 to index
    %c0_23 = arith.constant 0 : index
    %66 = vector.load %arg6[%65, %c0_23] : memref<9x32xf32, #tpu.memory_space<vmem>>, vector<1x32xf32>
    tpu.vector_store %arg6[%65, %c0_23], %64 {strides = array<i32>} : memref<9x32xf32, #tpu.memory_space<vmem>>, vector<1x32xf32>,
    %c3_i32_24 = arith.constant 3 : i32
    %67 = arith.addi %6, %c3_i32_24 : i32
    %68 = arith.index_cast %67 : i32 to index
    %69 = memref.load %arg1[%68] : memref<16xi32, #tpu.memory_space<smem>>
    %70 = arith.index_cast %69 : i32 to index
    %c0_25 = arith.constant 0 : index
    %71 = vector.load %arg6[%70, %c0_25] : memref<9x32xf32, #tpu.memory_space<vmem>>, vector<1x32xf32>
    %72 = vector.extract_strided_slice %39 {offsets = [3, 0], sizes = [1, 32], strides = [1, 1]} : vector<4x32xf32> to vector<1x32xf32>
    %73 = arith.addf %71, %72 : vector<1x32xf32>
    %74 = arith.index_cast %69 : i32 to index
    %c0_26 = arith.constant 0 : index
    %75 = vector.load %arg6[%74, %c0_26] : memref<9x32xf32, #tpu.memory_space<vmem>>, vector<1x32xf32>
    tpu.vector_store %arg6[%74, %c0_26], %73 {strides = array<i32>} : memref<9x32xf32, #tpu.memory_space<vmem>>, vector<1x32xf32>,
    %c1_i32_27 = arith.constant 1 : i32
    %c4_i32_28 = arith.constant 4 : i32
    %76 = arith.muli %c1_i32_27, %c4_i32_28 : i32
    %c0_i32_29 = arith.constant 0 : i32
    %77 = arith.addi %76, %c0_i32_29 : i32
    %78 = arith.index_cast %77 : i32 to index
    %79 = memref.load %arg0[%78] : memref<16xi32, #tpu.memory_space<smem>>
    %80 = arith.index_cast %79 : i32 to index
    %c0_30 = arith.constant 0 : index
    %81 = vector.load %arg6[%80, %c0_30] : memref<9x32xf32, #tpu.memory_space<vmem>>, vector<1x32xf32>
    %c0_31 = arith.constant 0 : index
    %c0_32 = arith.constant 0 : index
    %82 = vector.load %arg8[%c0_31, %c0_32] : memref<4x32xf32, #tpu.memory_space<vmem>>, vector<1x32xf32>
    tpu.vector_store %arg8[%c0_31, %c0_32], %81 {strides = array<i32>} : memref<4x32xf32, #tpu.memory_space<vmem>>, vector<1x32xf32>,
    %c1_i32_33 = arith.constant 1 : i32
    %83 = arith.addi %76, %c1_i32_33 : i32
    %84 = arith.index_cast %83 : i32 to index
    %85 = memref.load %arg0[%84] : memref<16xi32, #tpu.memory_space<smem>>
    %86 = arith.index_cast %85 : i32 to index
    %c0_34 = arith.constant 0 : index
    %87 = vector.load %arg6[%86, %c0_34] : memref<9x32xf32, #tpu.memory_space<vmem>>, vector<1x32xf32>
    %c1_35 = arith.constant 1 : index
    %c0_36 = arith.constant 0 : index
    %88 = vector.load %arg8[%c1_35, %c0_36] : memref<4x32xf32, #tpu.memory_space<vmem>>, vector<1x32xf32>
    tpu.vector_store %arg8[%c1_35, %c0_36], %87 {strides = array<i32>} : memref<4x32xf32, #tpu.memory_space<vmem>>, vector<1x32xf32>,
    %c2_i32_37 = arith.constant 2 : i32
    %89 = arith.addi %76, %c2_i32_37 : i32
    %90 = arith.index_cast %89 : i32 to index
    %91 = memref.load %arg0[%90] : memref<16xi32, #tpu.memory_space<smem>>
    %92 = arith.index_cast %91 : i32 to index
    %c0_38 = arith.constant 0 : index
    %93 = vector.load %arg6[%92, %c0_38] : memref<9x32xf32, #tpu.memory_space<vmem>>, vector<1x32xf32>
    %c2_39 = arith.constant 2 : index
    %c0_40 = arith.constant 0 : index
    %94 = vector.load %arg8[%c2_39, %c0_40] : memref<4x32xf32, #tpu.memory_space<vmem>>, vector<1x32xf32>
    tpu.vector_store %arg8[%c2_39, %c0_40], %93 {strides = array<i32>} : memref<4x32xf32, #tpu.memory_space<vmem>>, vector<1x32xf32>,
    %c3_i32_41 = arith.constant 3 : i32
    %95 = arith.addi %76, %c3_i32_41 : i32
    %96 = arith.index_cast %95 : i32 to index
    %97 = memref.load %arg0[%96] : memref<16xi32, #tpu.memory_space<smem>>
    %98 = arith.index_cast %97 : i32 to index
    %c0_42 = arith.constant 0 : index
    %99 = vector.load %arg6[%98, %c0_42] : memref<9x32xf32, #tpu.memory_space<vmem>>, vector<1x32xf32>
    %c3_43 = arith.constant 3 : index
    %c0_44 = arith.constant 0 : index
    %100 = vector.load %arg8[%c3_43, %c0_44] : memref<4x32xf32, #tpu.memory_space<vmem>>, vector<1x32xf32>
    tpu.vector_store %arg8[%c3_43, %c0_44], %99 {strides = array<i32>} : memref<4x32xf32, #tpu.memory_space<vmem>>, vector<1x32xf32>,
    %c0_45 = arith.constant 0 : index
    %c0_46 = arith.constant 0 : index
    %101 = vector.load %arg8[%c0_45, %c0_46] : memref<4x32xf32, #tpu.memory_space<vmem>>, vector<4x32xf32>
    %102 = arith.mulf %101, %101 : vector<4x32xf32>
    %cst_47 = arith.constant dense<0.000000e+00> : vector<4xf32>
    %103 = vector.multi_reduction <add>, %102, %cst_47 [1] : vector<4x32xf32> to vector<4xf32>
    %104 = vector.shape_cast %103 : vector<4xf32> to vector<4x1xf32>
    %cst_48 = arith.constant 1.000000e-24 : f32
    %105 = vector.broadcast %cst_48 : f32 to vector<4x1xf32>
    %106 = arith.maximumf %104, %105 : vector<4x1xf32>
    %107 = math.rsqrt %106 : vector<4x1xf32>
    %108 = vector.broadcast %107 : vector<4x1xf32> to vector<4x32xf32>
    %109 = arith.mulf %101, %108 : vector<4x32xf32>
    %c0_i32_49 = arith.constant 0 : i32
    %110 = arith.addi %76, %c0_i32_49 : i32
    %111 = arith.index_cast %110 : i32 to index
    %112 = memref.load %arg1[%111] : memref<16xi32, #tpu.memory_space<smem>>
    %113 = arith.index_cast %112 : i32 to index
    %c0_50 = arith.constant 0 : index
    %114 = vector.load %arg6[%113, %c0_50] : memref<9x32xf32, #tpu.memory_space<vmem>>, vector<1x32xf32>
    %115 = vector.extract_strided_slice %109 {offsets = [0, 0], sizes = [1, 32], strides = [1, 1]} : vector<4x32xf32> to vector<1x32xf32>
    %116 = arith.addf %114, %115 : vector<1x32xf32>
    %117 = arith.index_cast %112 : i32 to index
    %c0_51 = arith.constant 0 : index
    %118 = vector.load %arg6[%117, %c0_51] : memref<9x32xf32, #tpu.memory_space<vmem>>, vector<1x32xf32>
    tpu.vector_store %arg6[%117, %c0_51], %116 {strides = array<i32>} : memref<9x32xf32, #tpu.memory_space<vmem>>, vector<1x32xf32>,
    %c1_i32_52 = arith.constant 1 : i32
    %119 = arith.addi %76, %c1_i32_52 : i32
    %120 = arith.index_cast %119 : i32 to index
    %121 = memref.load %arg1[%120] : memref<16xi32, #tpu.memory_space<smem>>
    %122 = arith.index_cast %121 : i32 to index
    %c0_53 = arith.constant 0 : index
    %123 = vector.load %arg6[%122, %c0_53] : memref<9x32xf32, #tpu.memory_space<vmem>>, vector<1x32xf32>
    %124 = vector.extract_strided_slice %109 {offsets = [1, 0], sizes = [1, 32], strides = [1, 1]} : vector<4x32xf32> to vector<1x32xf32>
    %125 = arith.addf %123, %124 : vector<1x32xf32>
    %126 = arith.index_cast %121 : i32 to index
    %c0_54 = arith.constant 0 : index
    %127 = vector.load %arg6[%126, %c0_54] : memref<9x32xf32, #tpu.memory_space<vmem>>, vector<1x32xf32>
    tpu.vector_store %arg6[%126, %c0_54], %125 {strides = array<i32>} : memref<9x32xf32, #tpu.memory_space<vmem>>, vector<1x32xf32>,
    %c2_i32_55 = arith.constant 2 : i32
    %128 = arith.addi %76, %c2_i32_55 : i32
    %129 = arith.index_cast %128 : i32 to index
    %130 = memref.load %arg1[%129] : memref<16xi32, #tpu.memory_space<smem>>
    %131 = arith.index_cast %130 : i32 to index
    %c0_56 = arith.constant 0 : index
    %132 = vector.load %arg6[%131, %c0_56] : memref<9x32xf32, #tpu.memory_space<vmem>>, vector<1x32xf32>
    %133 = vector.extract_strided_slice %109 {offsets = [2, 0], sizes = [1, 32], strides = [1, 1]} : vector<4x32xf32> to vector<1x32xf32>
    %134 = arith.addf %132, %133 : vector<1x32xf32>
    %135 = arith.index_cast %130 : i32 to index
    %c0_57 = arith.constant 0 : index
    %136 = vector.load %arg6[%135, %c0_57] : memref<9x32xf32, #tpu.memory_space<vmem>>, vector<1x32xf32>
    tpu.vector_store %arg6[%135, %c0_57], %134 {strides = array<i32>} : memref<9x32xf32, #tpu.memory_space<vmem>>, vector<1x32xf32>,
    %c3_i32_58 = arith.constant 3 : i32
    %137 = arith.addi %76, %c3_i32_58 : i32
    %138 = arith.index_cast %137 : i32 to index
    %139 = memref.load %arg1[%138] : memref<16xi32, #tpu.memory_space<smem>>
    %140 = arith.index_cast %139 : i32 to index
    %c0_59 = arith.constant 0 : index
    %141 = vector.load %arg6[%140, %c0_59] : memref<9x32xf32, #tpu.memory_space<vmem>>, vector<1x32xf32>
    %142 = vector.extract_strided_slice %109 {offsets = [3, 0], sizes = [1, 32], strides = [1, 1]} : vector<4x32xf32> to vector<1x32xf32>
    %143 = arith.addf %141, %142 : vector<1x32xf32>
    %144 = arith.index_cast %139 : i32 to index
    %c0_60 = arith.constant 0 : index
    %145 = vector.load %arg6[%144, %c0_60] : memref<9x32xf32, #tpu.memory_space<vmem>>, vector<1x32xf32>
    tpu.vector_store %arg6[%144, %c0_60], %143 {strides = array<i32>} : memref<9x32xf32, #tpu.memory_space<vmem>>, vector<1x32xf32>,
    %c2_i32_61 = arith.constant 2 : i32
    %c4_i32_62 = arith.constant 4 : i32
    %146 = arith.muli %c2_i32_61, %c4_i32_62 : i32
    %c0_i32_63 = arith.constant 0 : i32
    %147 = arith.addi %146, %c0_i32_63 : i32
    %148 = arith.index_cast %147 : i32 to index
    %149 = memref.load %arg0[%148] : memref<16xi32, #tpu.memory_space<smem>>
    %150 = arith.index_cast %149 : i32 to index
    %c0_64 = arith.constant 0 : index
    %151 = vector.load %arg6[%150, %c0_64] : memref<9x32xf32, #tpu.memory_space<vmem>>, vector<1x32xf32>
    %c0_65 = arith.constant 0 : index
    %c0_66 = arith.constant 0 : index
    %152 = vector.load %arg8[%c0_65, %c0_66] : memref<4x32xf32, #tpu.memory_space<vmem>>, vector<1x32xf32>
    tpu.vector_store %arg8[%c0_65, %c0_66], %151 {strides = array<i32>} : memref<4x32xf32, #tpu.memory_space<vmem>>, vector<1x32xf32>,
    %c1_i32_67 = arith.constant 1 : i32
    %153 = arith.addi %146, %c1_i32_67 : i32
    %154 = arith.index_cast %153 : i32 to index
    %155 = memref.load %arg0[%154] : memref<16xi32, #tpu.memory_space<smem>>
    %156 = arith.index_cast %155 : i32 to index
    %c0_68 = arith.constant 0 : index
    %157 = vector.load %arg6[%156, %c0_68] : memref<9x32xf32, #tpu.memory_space<vmem>>, vector<1x32xf32>
    %c1_69 = arith.constant 1 : index
    %c0_70 = arith.constant 0 : index
    %158 = vector.load %arg8[%c1_69, %c0_70] : memref<4x32xf32, #tpu.memory_space<vmem>>, vector<1x32xf32>
    tpu.vector_store %arg8[%c1_69, %c0_70], %157 {strides = array<i32>} : memref<4x32xf32, #tpu.memory_space<vmem>>, vector<1x32xf32>,
    %c2_i32_71 = arith.constant 2 : i32
    %159 = arith.addi %146, %c2_i32_71 : i32
    %160 = arith.index_cast %159 : i32 to index
    %161 = memref.load %arg0[%160] : memref<16xi32, #tpu.memory_space<smem>>
    %162 = arith.index_cast %161 : i32 to index
    %c0_72 = arith.constant 0 : index
    %163 = vector.load %arg6[%162, %c0_72] : memref<9x32xf32, #tpu.memory_space<vmem>>, vector<1x32xf32>
    %c2_73 = arith.constant 2 : index
    %c0_74 = arith.constant 0 : index
    %164 = vector.load %arg8[%c2_73, %c0_74] : memref<4x32xf32, #tpu.memory_space<vmem>>, vector<1x32xf32>
    tpu.vector_store %arg8[%c2_73, %c0_74], %163 {strides = array<i32>} : memref<4x32xf32, #tpu.memory_space<vmem>>, vector<1x32xf32>,
    %c3_i32_75 = arith.constant 3 : i32
    %165 = arith.addi %146, %c3_i32_75 : i32
    %166 = arith.index_cast %165 : i32 to index
    %167 = memref.load %arg0[%166] : memref<16xi32, #tpu.memory_space<smem>>
    %168 = arith.index_cast %167 : i32 to index
    %c0_76 = arith.constant 0 : index
    %169 = vector.load %arg6[%168, %c0_76] : memref<9x32xf32, #tpu.memory_space<vmem>>, vector<1x32xf32>
    %c3_77 = arith.constant 3 : index
    %c0_78 = arith.constant 0 : index
    %170 = vector.load %arg8[%c3_77, %c0_78] : memref<4x32xf32, #tpu.memory_space<vmem>>, vector<1x32xf32>
    tpu.vector_store %arg8[%c3_77, %c0_78], %169 {strides = array<i32>} : memref<4x32xf32, #tpu.memory_space<vmem>>, vector<1x32xf32>,
    %c0_79 = arith.constant 0 : index
    %c0_80 = arith.constant 0 : index
    %171 = vector.load %arg8[%c0_79, %c0_80] : memref<4x32xf32, #tpu.memory_space<vmem>>, vector<4x32xf32>
    %172 = arith.mulf %171, %171 : vector<4x32xf32>
    %cst_81 = arith.constant dense<0.000000e+00> : vector<4xf32>
    %173 = vector.multi_reduction <add>, %172, %cst_81 [1] : vector<4x32xf32> to vector<4xf32>
    %174 = vector.shape_cast %173 : vector<4xf32> to vector<4x1xf32>
    %cst_82 = arith.constant 1.000000e-24 : f32
    %175 = vector.broadcast %cst_82 : f32 to vector<4x1xf32>
    %176 = arith.maximumf %174, %175 : vector<4x1xf32>
    %177 = math.rsqrt %176 : vector<4x1xf32>
    %178 = vector.broadcast %177 : vector<4x1xf32> to vector<4x32xf32>
    %179 = arith.mulf %171, %178 : vector<4x32xf32>
    %c0_i32_83 = arith.constant 0 : i32
    %180 = arith.addi %146, %c0_i32_83 : i32
    %181 = arith.index_cast %180 : i32 to index
    %182 = memref.load %arg1[%181] : memref<16xi32, #tpu.memory_space<smem>>
    %183 = arith.index_cast %182 : i32 to index
    %c0_84 = arith.constant 0 : index
    %184 = vector.load %arg6[%183, %c0_84] : memref<9x32xf32, #tpu.memory_space<vmem>>, vector<1x32xf32>
    %185 = vector.extract_strided_slice %179 {offsets = [0, 0], sizes = [1, 32], strides = [1, 1]} : vector<4x32xf32> to vector<1x32xf32>
    %186 = arith.addf %184, %185 : vector<1x32xf32>
    %187 = arith.index_cast %182 : i32 to index
    %c0_85 = arith.constant 0 : index
    %188 = vector.load %arg6[%187, %c0_85] : memref<9x32xf32, #tpu.memory_space<vmem>>, vector<1x32xf32>
    tpu.vector_store %arg6[%187, %c0_85], %186 {strides = array<i32>} : memref<9x32xf32, #tpu.memory_space<vmem>>, vector<1x32xf32>,
    %c1_i32_86 = arith.constant 1 : i32
    %189 = arith.addi %146, %c1_i32_86 : i32
    %190 = arith.index_cast %189 : i32 to index
    %191 = memref.load %arg1[%190] : memref<16xi32, #tpu.memory_space<smem>>
    %192 = arith.index_cast %191 : i32 to index
    %c0_87 = arith.constant 0 : index
    %193 = vector.load %arg6[%192, %c0_87] : memref<9x32xf32, #tpu.memory_space<vmem>>, vector<1x32xf32>
    %194 = vector.extract_strided_slice %179 {offsets = [1, 0], sizes = [1, 32], strides = [1, 1]} : vector<4x32xf32> to vector<1x32xf32>
    %195 = arith.addf %193, %194 : vector<1x32xf32>
    %196 = arith.index_cast %191 : i32 to index
    %c0_88 = arith.constant 0 : index
    %197 = vector.load %arg6[%196, %c0_88] : memref<9x32xf32, #tpu.memory_space<vmem>>, vector<1x32xf32>
    tpu.vector_store %arg6[%196, %c0_88], %195 {strides = array<i32>} : memref<9x32xf32, #tpu.memory_space<vmem>>, vector<1x32xf32>,
    %c2_i32_89 = arith.constant 2 : i32
    %198 = arith.addi %146, %c2_i32_89 : i32
    %199 = arith.index_cast %198 : i32 to index
    %200 = memref.load %arg1[%199] : memref<16xi32, #tpu.memory_space<smem>>
    %201 = arith.index_cast %200 : i32 to index
    %c0_90 = arith.constant 0 : index
    %202 = vector.load %arg6[%201, %c0_90] : memref<9x32xf32, #tpu.memory_space<vmem>>, vector<1x32xf32>
    %203 = vector.extract_strided_slice %179 {offsets = [2, 0], sizes = [1, 32], strides = [1, 1]} : vector<4x32xf32> to vector<1x32xf32>
    %204 = arith.addf %202, %203 : vector<1x32xf32>
    %205 = arith.index_cast %200 : i32 to index
    %c0_91 = arith.constant 0 : index
    %206 = vector.load %arg6[%205, %c0_91] : memref<9x32xf32, #tpu.memory_space<vmem>>, vector<1x32xf32>
    tpu.vector_store %arg6[%205, %c0_91], %204 {strides = array<i32>} : memref<9x32xf32, #tpu.memory_space<vmem>>, vector<1x32xf32>,
    %c3_i32_92 = arith.constant 3 : i32
    %207 = arith.addi %146, %c3_i32_92 : i32
    %208 = arith.index_cast %207 : i32 to index
    %209 = memref.load %arg1[%208] : memref<16xi32, #tpu.memory_space<smem>>
    %210 = arith.index_cast %209 : i32 to index
    %c0_93 = arith.constant 0 : index
    %211 = vector.load %arg6[%210, %c0_93] : memref<9x32xf32, #tpu.memory_space<vmem>>, vector<1x32xf32>
    %212 = vector.extract_strided_slice %179 {offsets = [3, 0], sizes = [1, 32], strides = [1, 1]} : vector<4x32xf32> to vector<1x32xf32>
    %213 = arith.addf %211, %212 : vector<1x32xf32>
    %214 = arith.index_cast %209 : i32 to index
    %c0_94 = arith.constant 0 : index
    %215 = vector.load %arg6[%214, %c0_94] : memref<9x32xf32, #tpu.memory_space<vmem>>, vector<1x32xf32>
    tpu.vector_store %arg6[%214, %c0_94], %213 {strides = array<i32>} : memref<9x32xf32, #tpu.memory_space<vmem>>, vector<1x32xf32>,
    %c3_i32_95 = arith.constant 3 : i32
    %c4_i32_96 = arith.constant 4 : i32
    %216 = arith.muli %c3_i32_95, %c4_i32_96 : i32
    %c0_i32_97 = arith.constant 0 : i32
    %217 = arith.addi %216, %c0_i32_97 : i32
    %218 = arith.index_cast %217 : i32 to index
    %219 = memref.load %arg0[%218] : memref<16xi32, #tpu.memory_space<smem>>
    %220 = arith.index_cast %219 : i32 to index
    %c0_98 = arith.constant 0 : index
    %221 = vector.load %arg6[%220, %c0_98] : memref<9x32xf32, #tpu.memory_space<vmem>>, vector<1x32xf32>
    %c0_99 = arith.constant 0 : index
    %c0_100 = arith.constant 0 : index
    %222 = vector.load %arg8[%c0_99, %c0_100] : memref<4x32xf32, #tpu.memory_space<vmem>>, vector<1x32xf32>
    tpu.vector_store %arg8[%c0_99, %c0_100], %221 {strides = array<i32>} : memref<4x32xf32, #tpu.memory_space<vmem>>, vector<1x32xf32>,
    %c1_i32_101 = arith.constant 1 : i32
    %223 = arith.addi %216, %c1_i32_101 : i32
    %224 = arith.index_cast %223 : i32 to index
    %225 = memref.load %arg0[%224] : memref<16xi32, #tpu.memory_space<smem>>
    %226 = arith.index_cast %225 : i32 to index
    %c0_102 = arith.constant 0 : index
    %227 = vector.load %arg6[%226, %c0_102] : memref<9x32xf32, #tpu.memory_space<vmem>>, vector<1x32xf32>
    %c1_103 = arith.constant 1 : index
    %c0_104 = arith.constant 0 : index
    %228 = vector.load %arg8[%c1_103, %c0_104] : memref<4x32xf32, #tpu.memory_space<vmem>>, vector<1x32xf32>
    tpu.vector_store %arg8[%c1_103, %c0_104], %227 {strides = array<i32>} : memref<4x32xf32, #tpu.memory_space<vmem>>, vector<1x32xf32>,
    %c2_i32_105 = arith.constant 2 : i32
    %229 = arith.addi %216, %c2_i32_105 : i32
    %230 = arith.index_cast %229 : i32 to index
    %231 = memref.load %arg0[%230] : memref<16xi32, #tpu.memory_space<smem>>
    %232 = arith.index_cast %231 : i32 to index
    %c0_106 = arith.constant 0 : index
    %233 = vector.load %arg6[%232, %c0_106] : memref<9x32xf32, #tpu.memory_space<vmem>>, vector<1x32xf32>
    %c2_107 = arith.constant 2 : index
    %c0_108 = arith.constant 0 : index
    %234 = vector.load %arg8[%c2_107, %c0_108] : memref<4x32xf32, #tpu.memory_space<vmem>>, vector<1x32xf32>
    tpu.vector_store %arg8[%c2_107, %c0_108], %233 {strides = array<i32>} : memref<4x32xf32, #tpu.memory_space<vmem>>, vector<1x32xf32>,
    %c3_i32_109 = arith.constant 3 : i32
    %235 = arith.addi %216, %c3_i32_109 : i32
    %236 = arith.index_cast %235 : i32 to index
    %237 = memref.load %arg0[%236] : memref<16xi32, #tpu.memory_space<smem>>
    %238 = arith.index_cast %237 : i32 to index
    %c0_110 = arith.constant 0 : index
    %239 = vector.load %arg6[%238, %c0_110] : memref<9x32xf32, #tpu.memory_space<vmem>>, vector<1x32xf32>
    %c3_111 = arith.constant 3 : index
    %c0_112 = arith.constant 0 : index
    %240 = vector.load %arg8[%c3_111, %c0_112] : memref<4x32xf32, #tpu.memory_space<vmem>>, vector<1x32xf32>
    tpu.vector_store %arg8[%c3_111, %c0_112], %239 {strides = array<i32>} : memref<4x32xf32, #tpu.memory_space<vmem>>, vector<1x32xf32>,
    %c0_113 = arith.constant 0 : index
    %c0_114 = arith.constant 0 : index
    %241 = vector.load %arg8[%c0_113, %c0_114] : memref<4x32xf32, #tpu.memory_space<vmem>>, vector<4x32xf32>
    %242 = arith.mulf %241, %241 : vector<4x32xf32>
    %cst_115 = arith.constant dense<0.000000e+00> : vector<4xf32>
    %243 = vector.multi_reduction <add>, %242, %cst_115 [1] : vector<4x32xf32> to vector<4xf32>
    %244 = vector.shape_cast %243 : vector<4xf32> to vector<4x1xf32>
    %cst_116 = arith.constant 1.000000e-24 : f32
    %245 = vector.broadcast %cst_116 : f32 to vector<4x1xf32>
    %246 = arith.maximumf %244, %245 : vector<4x1xf32>
    %247 = math.rsqrt %246 : vector<4x1xf32>
    %248 = vector.broadcast %247 : vector<4x1xf32> to vector<4x32xf32>
    %249 = arith.mulf %241, %248 : vector<4x32xf32>
    %c0_i32_117 = arith.constant 0 : i32
    %250 = arith.addi %216, %c0_i32_117 : i32
    %251 = arith.index_cast %250 : i32 to index
    %252 = memref.load %arg1[%251] : memref<16xi32, #tpu.memory_space<smem>>
    %253 = arith.index_cast %252 : i32 to index
    %c0_118 = arith.constant 0 : index
    %254 = vector.load %arg6[%253, %c0_118] : memref<9x32xf32, #tpu.memory_space<vmem>>, vector<1x32xf32>
    %255 = vector.extract_strided_slice %249 {offsets = [0, 0], sizes = [1, 32], strides = [1, 1]} : vector<4x32xf32> to vector<1x32xf32>
    %256 = arith.addf %254, %255 : vector<1x32xf32>
    %257 = arith.index_cast %252 : i32 to index
    %c0_119 = arith.constant 0 : index
    %258 = vector.load %arg6[%257, %c0_119] : memref<9x32xf32, #tpu.memory_space<vmem>>, vector<1x32xf32>
    tpu.vector_store %arg6[%257, %c0_119], %256 {strides = array<i32>} : memref<9x32xf32, #tpu.memory_space<vmem>>, vector<1x32xf32>,
    %c1_i32_120 = arith.constant 1 : i32
    %259 = arith.addi %216, %c1_i32_120 : i32
    %260 = arith.index_cast %259 : i32 to index
    %261 = memref.load %arg1[%260] : memref<16xi32, #tpu.memory_space<smem>>
    %262 = arith.index_cast %261 : i32 to index
    %c0_121 = arith.constant 0 : index
    %263 = vector.load %arg6[%262, %c0_121] : memref<9x32xf32, #tpu.memory_space<vmem>>, vector<1x32xf32>
    %264 = vector.extract_strided_slice %249 {offsets = [1, 0], sizes = [1, 32], strides = [1, 1]} : vector<4x32xf32> to vector<1x32xf32>
    %265 = arith.addf %263, %264 : vector<1x32xf32>
    %266 = arith.index_cast %261 : i32 to index
    %c0_122 = arith.constant 0 : index
    %267 = vector.load %arg6[%266, %c0_122] : memref<9x32xf32, #tpu.memory_space<vmem>>, vector<1x32xf32>
    tpu.vector_store %arg6[%266, %c0_122], %265 {strides = array<i32>} : memref<9x32xf32, #tpu.memory_space<vmem>>, vector<1x32xf32>,
    %c2_i32_123 = arith.constant 2 : i32
    %268 = arith.addi %216, %c2_i32_123 : i32
    %269 = arith.index_cast %268 : i32 to index
    %270 = memref.load %arg1[%269] : memref<16xi32, #tpu.memory_space<smem>>
    %271 = arith.index_cast %270 : i32 to index
    %c0_124 = arith.constant 0 : index
    %272 = vector.load %arg6[%271, %c0_124] : memref<9x32xf32, #tpu.memory_space<vmem>>, vector<1x32xf32>
    %273 = vector.extract_strided_slice %249 {offsets = [2, 0], sizes = [1, 32], strides = [1, 1]} : vector<4x32xf32> to vector<1x32xf32>
    %274 = arith.addf %272, %273 : vector<1x32xf32>
    %275 = arith.index_cast %270 : i32 to index
    %c0_125 = arith.constant 0 : index
    %276 = vector.load %arg6[%275, %c0_125] : memref<9x32xf32, #tpu.memory_space<vmem>>, vector<1x32xf32>
    tpu.vector_store %arg6[%275, %c0_125], %274 {strides = array<i32>} : memref<9x32xf32, #tpu.memory_space<vmem>>, vector<1x32xf32>,
    %c3_i32_126 = arith.constant 3 : i32
    %277 = arith.addi %216, %c3_i32_126 : i32
    %278 = arith.index_cast %277 : i32 to index
    %279 = memref.load %arg1[%278] : memref<16xi32, #tpu.memory_space<smem>>
    %280 = arith.index_cast %279 : i32 to index
    %c0_127 = arith.constant 0 : index
    %281 = vector.load %arg6[%280, %c0_127] : memref<9x32xf32, #tpu.memory_space<vmem>>, vector<1x32xf32>
    %282 = vector.extract_strided_slice %249 {offsets = [3, 0], sizes = [1, 32], strides = [1, 1]} : vector<4x32xf32> to vector<1x32xf32>
    %283 = arith.addf %281, %282 : vector<1x32xf32>
    %284 = arith.index_cast %279 : i32 to index
    %c0_128 = arith.constant 0 : index
    %285 = vector.load %arg6[%284, %c0_128] : memref<9x32xf32, #tpu.memory_space<vmem>>, vector<1x32xf32>
    tpu.vector_store %arg6[%284, %c0_128], %283 {strides = array<i32>} : memref<9x32xf32, #tpu.memory_space<vmem>>, vector<1x32xf32>,
    %c4_i32_129 = arith.constant 4 : i32
    %286 = tpu.iota {dimensions = array<i32: 1>} : vector<9x32xi32>
    %c31_i32 = arith.constant 31 : i32
    %287 = vector.broadcast %c31_i32 : i32 to vector<9x32xi32>
    %288 = arith.cmpi eq, %286, %287 : vector<9x32xi32>
    %c0_130 = arith.constant 0 : index
    %c0_131 = arith.constant 0 : index
    %289 = vector.load %arg2[%c0_130, %c0_131] : memref<9x1xf32, #tpu.memory_space<vmem>>, vector<9x1xf32>
    %c0_132 = arith.constant 0 : index
    %c0_133 = arith.constant 0 : index
    %290 = vector.load %arg6[%c0_132, %c0_133] : memref<9x32xf32, #tpu.memory_space<vmem>>, vector<9x32xf32>
    %291 = vector.shape_cast %289 : vector<9x1xf32> to vector<9x1xf32>
    %292 = vector.broadcast %291 : vector<9x1xf32> to vector<9x32xf32>
    %293 = arith.select %288, %292, %290 : vector<9x32xi1>, vector<9x32xf32>
    %c0_i32_134 = arith.constant 0 : i32
    %294 = tpu.memref_slice %arg9[%c0_i32_134] : memref<2x!tpu.dma_semaphore, #tpu.memory_space<semaphore_mem>> -> memref<1x!tpu.dma_semaphore, #tpu.memory_space<semaphore_mem>>
    %295 = tpu.memref_squeeze %294 : memref<1x!tpu.dma_semaphore, #tpu.memory_space<semaphore_mem>> -> memref<!tpu.dma_semaphore, #tpu.memory_space<semaphore_mem>>
    tpu.wait_dma2 semaphore(%295 : memref<!tpu.dma_semaphore, #tpu.memory_space<semaphore_mem>>) src(%arg4 : memref<32x128xf32, #tpu.memory_space<any>>) dst(%arg7 : memref<32x128xf32, #tpu.memory_space<vmem>>)
    %c0_135 = arith.constant 0 : index
    %c0_136 = arith.constant 0 : index
    %296 = vector.load %arg7[%c0_135, %c0_136] : memref<32x128xf32, #tpu.memory_space<vmem>>, vector<32x128xf32>
    %cst_137 = arith.constant dense<0.000000e+00> : vector<9x128xf32>
    %297 = tpu.matmul %293, %296, %cst_137 {dimension_numbers = #tpu.dot_dimension_numbers<[1], [0], [0], [1], [0, 0, 1, 1], [], []>} : vector<9x32xf32>, vector<32x128xf32>, vector<9x128xf32> -> vector<9x128xf32>
    %298 = math.tanh %297 : vector<9x128xf32>
    %c0_138 = arith.constant 0 : index
    %c0_139 = arith.constant 0 : index
    %299 = vector.load %arg5[%c0_138, %c0_139] : memref<9x128xf32, #tpu.memory_space<vmem>>, vector<9x128xf32>
    tpu.vector_store %arg5[%c0_138, %c0_139], %298 {strides = array<i32>} : memref<9x128xf32, #tpu.memory_space<vmem>>, vector<9x128xf32>,
    return
  }
}

</mosaic_0001>

<bundles_post_ra>
// kernel: tpu_custom_call.1
= control target key start
LH: loop header
LB: loop body
LE: loop exit
PB: predicated region body
PF: predicated region fallthrough
CT: control target
= control target key end

     0   :  { %10 = vsyncpa [#allocation8], 0  ;;  %s752_s0 = inlined_call_operand.vmem [shape: s32[16], index: 0, kind: input, shape index: {}]   ;;  %s753_s1 = inlined_call_operand.vmem [shape: s32[16], index: 1, kind: input, shape index: {}]   ;;  %s754_s2 = inlined_call_operand.vmem [shape: f32[9,1], index: 2, kind: input, shape index: {}]   ;;  %s755_s3 = inlined_call_operand.vmem [shape: f32[9,32], index: 3, kind: input, shape index: {}]   ;;  %s756_s4 = inlined_call_operand.hbm [shape: f32[32,128], index: 4, kind: input, shape index: {}]   ;;  %s757_s5 = inlined_call_operand.hbm [shape: f32[9,128], index: 5, kind: output, shape index: {}]  }
   0x1   :  { %11 = vsyncpa [#allocation10], 0 }
   0x2   :  { %12 = vsyncpa [#allocation7], 0  ;;  %s19_s20 = sshll.u32 %s752_s0, 4  ;;  %s29_s23 = sshll.u32 %s753_s1, 4  ;;  %s20_s20 = int_to_ptr.vmem [resolvable:$true] %s19_s20  ;;  %s30_s23 = int_to_ptr.vmem [resolvable:$true] %s29_s23 }
   0x3   :  { %s581_s24 = scalar_lea.vmem %s20_s20, 16  ;;  %p586_p1 = scmp.lt.s32.totalorder %s20_s20, %s20_s20 }
   0x4   :  { %p582_p0 = scmp.ne.s32.totalorder %s20_s20, %s581_s24  ;;  %p587_p2 = scmp.lt.s32.totalorder %s581_s24, %s581_s24 }
   0x6   :  { %p588_p3 = por %p587_p2, %p586_p1 }
   0x8   :  { %p589_p4 = pnand %p588_p3, %p582_p0 }
   0xa   :  { %592 = shalt.err (!%p589_p4)
}
   0xb   :  { %s655_s25 = smov [#allocation6]   ;;  %s593_s26 = scalar_lea.vmem %s30_s23, 16 }
   0xc   :  { %22 = dma.vmem_to_smem %s20_s20, 16, %s655_s25, [#allocation8]  }
   0xd   :  { %p594_p5 = scmp.ne.s32.totalorder %s30_s23, %s593_s26  ;;  %p598_p6 = scmp.lt.s32.totalorder %s30_s23, %s30_s23 }
   0xe   :  { %p599_p7 = scmp.lt.s32.totalorder %s593_s26, %s593_s26 }
  0x10   :  { %p600_p8 = por %p599_p7, %p598_p6 }
  0x12   :  { %p601_p9 = pnand %p600_p8, %p594_p5 }
  0x14   :  { %604 = shalt.err (!%p601_p9)
}
  0x15   :  { %s656_s0 = smov [#allocation9]  }
  0x16   :  { %32 = dma.vmem_to_smem %s30_s23, 16, %s656_s0, [#allocation10]  }
  0x17   :  { %645 = dma.done.wait [#allocation8], 16  }
  0x18   :  { %646 = vsyncadd [#allocation8], 4294967280 }
  0x19   :  { %647 = dma.done.wait [#allocation10], 16  }
  0x1a   :  { %648 = vsyncadd [#allocation10], 4294967280 }
  0x1b   :  { %41 = sfence }
  0x1c   :  { %v92_v0 = vld [vmem:[%s755_s3] sm:$0xff]  ;;  %v508_v1 = vld [vmem:[%s755_s3 + $0x8] sm:$0x1]  ;;  %s657_s30 = smov [#allocation3]  }
  0x1d   :  { %s49_s6 = sshll.u32 %s657_s30, 4  ;;  %93 = vst [vmem:[#allocation2] sm:$0xff] %v92_v0  ;;  %105 = vst [vmem:[#allocation2 + $0x8] sm:$0x1] %v508_v1  ;;  %s50_s6 = int_to_ptr.vmem [resolvable:$true] %s49_s6 }
  0x1e   :  { %s613_s7 = scalar_lea.vmem %s50_s6, 512  ;;  %p618_p11 = scmp.lt.s32.totalorder %s50_s6, %s50_s6 }
  0x1f   :  { %p614_p10 = scmp.ne.s32.totalorder %s50_s6, %s613_s7  ;;  %p619_p12 = scmp.lt.s32.totalorder %s613_s7, %s613_s7 }
  0x21   :  { %p620_p13 = por %p619_p12, %p618_p11 }
  0x23   :  { %p621_p0 = pnand %p620_p13, %p614_p10 }
  0x25   :  { %624 = shalt.err (!%p621_p0)  }
  0x26   :  { %52 = dma.hbm_to_vmem [thread:$0]  %s756_s4, 512, %s50_s6, [#allocation5] }
  0x27   :  { %109 = vsyncadd [#allocation5 + $0x1], 144 }
  0x28   :  { %649 = dma.done.wait [#allocation5 + $0x1], 144 }
  0x29   :  { %650 = vsyncadd [#allocation5 + $0x1], 4294967152  ;;  %s113_s3 = sld [smem:[#allocation6]]  ;;  %vm116_vm0 = vcmask 253952   ;;  %vm132_vm1 = vcmask 257024   ;;  %v322_v53 = vld [vmem:[%s754_s2] sm:$0xff] }
  0x2a   :  { %s509_s10 = sld [smem:[#allocation6 + $0x1]]  ;;  %v658_v54 = vmov 0  }
  0x2b   :  { %s510_s11 = sld [smem:[#allocation6 + $0x2]]  ;;  %568 = vset.pattern.permute.xlu1 %v658_v54  ;;  %567 = vset.pattern.permute.xlu0 %v658_v54 }
  0x2c   :  { %s511_s12 = sld [smem:[#allocation6 + $0x3]] }
  0x2d   :  { %s139_s16 = sld [smem:[#allocation9]] }
  0x2e   :  { %s512_s18 = sld [smem:[#allocation9 + $0x1]] }
  0x2f   :  { %s114_s13 = scalar_lea.vmem [#allocation2], %s113_s3  ;;  %s513_s19 = sld [smem:[#allocation9 + $0x2]] }
  0x30   :  { %v115_v2 = vld [vmem:[%s114_s13] sm:$0x1]  ;;  %s119_s14 = scalar_lea.vmem [#allocation2], %s509_s10  ;;  %s514_s21 = sld [smem:[#allocation9 + $0x3]] }
  0x31   :  { %117 = vst.msk [vmem:[#allocation4] sm:$0x1] %vm116_vm0, %v115_v2  ;;  %v120_v3 = vld [vmem:[%s119_s14] sm:$0x1]  ;;  %s123_s15 = scalar_lea.vmem [#allocation2], %s510_s11  ;;  %s515_s23 = sld [smem:[#allocation6 + $0x4]] }
  0x32   :  { %121 = vst.msk [vmem:[#allocation4 + $0x1] sm:$0x1] %vm116_vm0, %v120_v3  ;;  %v124_v4 = vld [vmem:[%s123_s15] sm:$0x1]  ;;  %s127_s4 = scalar_lea.vmem [#allocation2], %s511_s12  ;;  %s516_s24 = sld [smem:[#allocation6 + $0x5]] }
  0x33   :  { %125 = vst.msk [vmem:[#allocation4 + $0x2] sm:$0x1] %vm116_vm0, %v124_v4  ;;  %v128_v5 = vld [vmem:[%s127_s4] sm:$0x1]  ;;  %s140_s17 = scalar_lea.vmem [#allocation2], %s139_s16  ;;  %s517_s25 = sld [smem:[#allocation6 + $0x6]] }
  0x34   :  { %129 = vst.msk [vmem:[#allocation4 + $0x3] sm:$0x1] %vm116_vm0, %v128_v5  ;;  %v141_v12 = vld [vmem:[%s140_s17] sm:$0x1]  ;;  %s145_s20 = scalar_lea.vmem [#allocation2], %s512_s18  ;;  %s518_s0 = sld [smem:[#allocation6 + $0x7]] }
  0x35   :  { %s153_s22 = scalar_lea.vmem [#allocation2], %s513_s19  ;;  %s519_s30 = sld [smem:[#allocation9 + $0x4]] }
  0x36   :  { %s160_s26 = scalar_lea.vmem [#allocation2], %s514_s21  ;;  %s520_s6 = sld [smem:[#allocation9 + $0x5]] }
  0x37   :  { %s167_s1 = scalar_lea.vmem [#allocation2], %s515_s23  ;;  %s521_s8 = sld [smem:[#allocation9 + $0x6]] }
  0x38   :  { %s171_s27 = scalar_lea.vmem [#allocation2], %s516_s24  ;;  %s522_s3 = sld [smem:[#allocation9 + $0x7]] }
  0x39   :  { %s175_s28 = scalar_lea.vmem [#allocation2], %s517_s25  ;;  %s523_s11 = sld [smem:[#allocation6 + $0x8]] }
  0x3a   :  { %s179_s29 = scalar_lea.vmem [#allocation2], %s518_s0  ;;  %s524_s12 = sld [smem:[#allocation6 + $0x9]] }
  0x3b   :  { %v130_v6 = vld [vmem:[#allocation4] sm:$0xf]  ;;  %s191_s7 = scalar_lea.vmem [#allocation2], %s519_s30  ;;  %s525_s13 = sld [smem:[#allocation6 + $0xa]] }
  0x3c   :  { %v131_v7 = vmul.f32 %v130_v6, %v130_v6  ;;  %s196_s9 = scalar_lea.vmem [#allocation2], %s520_s6  ;;  %s526_s15 = sld [smem:[#allocation6 + $0xb]] }
  0x3d   :  { %s204_s10 = scalar_lea.vmem [#allocation2], %s521_s8  ;;  %s527_s21 = sld [smem:[#allocation9 + $0x8]] }
  0x3e   :  { %v133_v8 = vsel %vm132_vm1, %v131_v7, 0.0  ;;  %s211_s14 = scalar_lea.vmem [#allocation2], %s522_s3  ;;  %s529_s24 = sld [smem:[#allocation9 + $0xa]] }
  0x3f   :  { %134 = vadd.xlane.f32.xlu0 %v133_v8  ;;  %s218_s4 = scalar_lea.vmem [#allocation2], %s523_s11  ;;  %s534_s30 = sld [smem:[#allocation6 + $0xf]] }
  0x40   :  { %s222_s16 = scalar_lea.vmem [#allocation2], %s524_s12  ;;  %s535_s11 = sld [smem:[#allocation9 + $0xc]] }
  0x41   :  { %s536_s12 = sld [smem:[#allocation9 + $0xd]] }
  0x42   :  { %s230_s18 = scalar_lea.vmem [#allocation2], %s526_s15 }
  0x43   :  { %s242_s23 = scalar_lea.vmem [#allocation2], %s527_s21 }
  0x44   :  { %s255_s0 = scalar_lea.vmem [#allocation2], %s529_s24 }
  0x47   :  { %s298_s15 = scalar_lea.vmem [#allocation2], %s536_s12 }
  0xc8   :  { %v135_v9 = vpop.xlane.xlu0 %134 }
  0xc9   :  { %v136_v10 = vmax.f32 %v135_v9, 1e-24 }
  0xcb   :  { %569 = vrsqrt.f32 %v136_v10 }
  0xd8   :  { %v570_v11 = vpop.eup %569 }
  0xd9   :  { %v138_v13 = vmul.f32 %v570_v11, %v130_v6 }
  0xdb   :  { %v142_v14 = vadd.f32 %v141_v12, %v138_v13  ;;  %v148_v15 = vrot.slane %v138_v13, 1  ;;  %v155_v18 = vrot.slane %v138_v13, 2  ;;  %v162_v21 = vrot.slane %v138_v13, 3  ;;  %v323_v13 = vld [vmem:[%s754_s2 + $0x8] sm:$0x1]  ;;  %s538_s2 = sld [smem:[#allocation9 + $0xf]] }
  0xdd   :  { %143 = vst.msk [vmem:[%s140_s17] sm:$0x1] %vm116_vm0, %v142_v14  ;;  %s226_s17 = scalar_lea.vmem [#allocation2], %s525_s13  ;;  %s293_s13 = scalar_lea.vmem [#allocation2], %s535_s11 }
  0xe4   :  { %v146_v16 = vld [vmem:[%s145_s20] sm:$0x1] }
  0xe5   :  { %v150_v17 = vadd.f32 %v148_v15, %v146_v16 }
  0xe7   :  { %151 = vst.msk [vmem:[%s145_s20] sm:$0x1] %vm116_vm0, %v150_v17 }
  0xee   :  { %v154_v19 = vld [vmem:[%s153_s22] sm:$0x1] }
  0xef   :  { %v157_v20 = vadd.f32 %v155_v18, %v154_v19 }
  0xf1   :  { %158 = vst.msk [vmem:[%s153_s22] sm:$0x1] %vm116_vm0, %v157_v20  ;;  %s528_s22 = sld [smem:[#allocation9 + $0x9]] }
  0xf7   :  { %s247_s25 = scalar_lea.vmem [#allocation2], %s528_s22 }
  0xf8   :  { %v161_v22 = vld [vmem:[%s160_s26] sm:$0x1] }
  0xf9   :  { %v164_v23 = vadd.f32 %v162_v21, %v161_v22 }
  0xfb   :  { %165 = vst.msk [vmem:[%s160_s26] sm:$0x1] %vm116_vm0, %v164_v23  ;;  %s530_s26 = sld [smem:[#allocation9 + $0xb]] }
 0x102   :  { %v168_v24 = vld [vmem:[%s167_s1] sm:$0x1]  ;;  %s531_s1 = sld [smem:[#allocation6 + $0xc]] }
 0x103   :  { %v172_v25 = vld [vmem:[%s171_s27] sm:$0x1]  ;;  %169 = vst.msk [vmem:[#allocation4] sm:$0x1] %vm116_vm0, %v168_v24  ;;  %s532_s27 = sld [smem:[#allocation6 + $0xd]] }
 0x104   :  { %v176_v26 = vld [vmem:[%s175_s28] sm:$0x1]  ;;  %173 = vst.msk [vmem:[#allocation4 + $0x1] sm:$0x1] %vm116_vm0, %v172_v25  ;;  %s533_s28 = sld [smem:[#allocation6 + $0xe]] }
 0x105   :  { %177 = vst.msk [vmem:[#allocation4 + $0x2] sm:$0x1] %vm116_vm0, %v176_v26  ;;  %v180_v27 = vld [vmem:[%s179_s29] sm:$0x1]  ;;  %s262_s29 = scalar_lea.vmem [#allocation2], %s530_s26 }
 0x106   :  { %181 = vst.msk [vmem:[#allocation4 + $0x3] sm:$0x1] %vm116_vm0, %v180_v27  ;;  %v192_v35 = vld [vmem:[%s191_s7] sm:$0x1] }
 0x108   :  { %s269_s6 = scalar_lea.vmem [#allocation2], %s531_s1 }
 0x10a   :  { %s277_s8 = scalar_lea.vmem [#allocation2], %s533_s28 }
 0x10d   :  { %v182_v28 = vld [vmem:[#allocation4] sm:$0xf] }
 0x10e   :  { %v183_v29 = vmul.f32 %v182_v28, %v182_v28 }
 0x110   :  { %v184_v30 = vsel %vm132_vm1, %v183_v29, 0.0 }
 0x111   :  { %185 = vadd.xlane.f32.xlu0 %v184_v30 }
 0x127   :  { %328 = vperm.xlu0 %567, %v322_v53  }
 0x19a   :  { %v186_v31 = vpop.xlane.xlu0 %185 }
 0x19b   :  { %v187_v32 = vmax.f32 %v186_v31, 1e-24 }
 0x19d   :  { %571 = vrsqrt.f32 %v187_v32 }
 0x1a2   :  { %v329_v32 = vpop.permute.xlu0 %328 }
 0x1aa   :  { %v572_v33 = vpop.eup %571 }
 0x1ab   :  { %v189_v34 = vmul.f32 %v572_v33, %v182_v28  ;;  %v319_v28 = vlaneseq }
 0x1ad   :  { %v193_v36 = vadd.f32 %v192_v35, %v189_v34  ;;  %v199_v37 = vrot.slane %v189_v34, 1  ;;  %v206_v40 = vrot.slane %v189_v34, 2  ;;  %v213_v43 = vrot.slane %v189_v34, 3 }
 0x1ae   :  { %v320_v30 = vand.u32 127, %v319_v28 }
 0x1af   :  { %194 = vst.msk [vmem:[%s191_s7] sm:$0x1] %vm116_vm0, %v193_v36  ;;  %s273_s7 = scalar_lea.vmem [#allocation2], %s532_s27 }
 0x1b0   :  { %vm321_vm2 = vcmp.eq.s32.totalorder %v320_v30, 31 }
 0x1b6   :  { %v197_v38 = vld [vmem:[%s196_s9] sm:$0x1] }
 0x1b7   :  { %v201_v39 = vadd.f32 %v199_v37, %v197_v38 }
 0x1b9   :  { %202 = vst.msk [vmem:[%s196_s9] sm:$0x1] %vm116_vm0, %v201_v39  ;;  %s281_s9 = scalar_lea.vmem [#allocation2], %s534_s30 }
 0x1c0   :  { %v205_v41 = vld [vmem:[%s204_s10] sm:$0x1] }
 0x1c1   :  { %v208_v42 = vadd.f32 %v206_v40, %v205_v41 }
 0x1c3   :  { %209 = vst.msk [vmem:[%s204_s10] sm:$0x1] %vm116_vm0, %v208_v42 }
 0x1ca   :  { %v212_v44 = vld [vmem:[%s211_s14] sm:$0x1] }
 0x1cb   :  { %v215_v45 = vadd.f32 %v213_v43, %v212_v44 }
 0x1cd   :  { %216 = vst.msk [vmem:[%s211_s14] sm:$0x1] %vm116_vm0, %v215_v45  ;;  %s537_s14 = sld [smem:[#allocation9 + $0xe]] }
 0x1d4   :  { %v219_v46 = vld [vmem:[%s218_s4] sm:$0x1]  ;;  %s306_s4 = scalar_lea.vmem [#allocation2], %s537_s14 }
 0x1d5   :  { %v223_v47 = vld [vmem:[%s222_s16] sm:$0x1]  ;;  %220 = vst.msk [vmem:[#allocation4] sm:$0x1] %vm116_vm0, %v219_v46  ;;  %s313_s16 = scalar_lea.vmem [#allocation2], %s538_s2 }
 0x1d6   :  { %v227_v48 = vld [vmem:[%s226_s17] sm:$0x1]  ;;  %224 = vst.msk [vmem:[#allocation4 + $0x1] sm:$0x1] %vm116_vm0, %v223_v47 }
 0x1d7   :  { %228 = vst.msk [vmem:[#allocation4 + $0x2] sm:$0x1] %vm116_vm0, %v227_v48  ;;  %v231_v49 = vld [vmem:[%s230_s18] sm:$0x1] }
 0x1d8   :  { %232 = vst.msk [vmem:[#allocation4 + $0x3] sm:$0x1] %vm116_vm0, %v231_v49  ;;  %v243_v59 = vld [vmem:[%s242_s23] sm:$0x1] }
 0x1df   :  { %v233_v50 = vld [vmem:[#allocation4] sm:$0xf] }
 0x1e0   :  { %v234_v51 = vmul.f32 %v233_v50, %v233_v50 }
 0x1e2   :  { %v235_v52 = vsel %vm132_vm1, %v234_v51, 0.0 }
 0x1e3   :  { %236 = vadd.xlane.f32.xlu1 %v235_v52 }
 0x26c   :  { %v237_v55 = vpop.xlane.xlu1 %236 }
 0x26d   :  { %v238_v56 = vmax.f32 %v237_v55, 1e-24 }
 0x26f   :  { %573 = vrsqrt.f32 %v238_v56 }
 0x27c   :  { %v574_v57 = vpop.eup %573 }
 0x27d   :  { %v240_v58 = vmul.f32 %v574_v57, %v233_v50 }
 0x27f   :  { %v244_v60 = vadd.f32 %v243_v59, %v240_v58  ;;  %v250_v61 = vrot.slane %v240_v58, 1  ;;  %v257_v0 = vrot.slane %v240_v58, 2  ;;  %v264_v3 = vrot.slane %v240_v58, 3 }
 0x281   :  { %245 = vst.msk [vmem:[%s242_s23] sm:$0x1] %vm116_vm0, %v244_v60 }
 0x288   :  { %v248_v62 = vld [vmem:[%s247_s25] sm:$0x1] }
 0x289   :  { %v252_v63 = vadd.f32 %v250_v61, %v248_v62 }
 0x28b   :  { %253 = vst.msk [vmem:[%s247_s25] sm:$0x1] %vm116_vm0, %v252_v63 }
 0x292   :  { %v256_v1 = vld [vmem:[%s255_s0] sm:$0x1] }
 0x293   :  { %v259_v2 = vadd.f32 %v257_v0, %v256_v1 }
 0x295   :  { %260 = vst.msk [vmem:[%s255_s0] sm:$0x1] %vm116_vm0, %v259_v2 }
 0x29c   :  { %v263_v4 = vld [vmem:[%s262_s29] sm:$0x1] }
 0x29d   :  { %v266_v5 = vadd.f32 %v264_v3, %v263_v4 }
 0x29f   :  { %267 = vst.msk [vmem:[%s262_s29] sm:$0x1] %vm116_vm0, %v266_v5 }
 0x2a6   :  { %v270_v6 = vld [vmem:[%s269_s6] sm:$0x1] }
 0x2a7   :  { %v274_v7 = vld [vmem:[%s273_s7] sm:$0x1]  ;;  %271 = vst.msk [vmem:[#allocation4] sm:$0x1] %vm116_vm0, %v270_v6 }
 0x2a8   :  { %v278_v8 = vld [vmem:[%s277_s8] sm:$0x1]  ;;  %275 = vst.msk [vmem:[#allocation4 + $0x1] sm:$0x1] %vm116_vm0, %v274_v7 }
 0x2a9   :  { %279 = vst.msk [vmem:[#allocation4 + $0x2] sm:$0x1] %vm116_vm0, %v278_v8  ;;  %v282_v9 = vld [vmem:[%s281_s9] sm:$0x1] }
 0x2aa   :  { %283 = vst.msk [vmem:[#allocation4 + $0x3] sm:$0x1] %vm116_vm0, %v282_v9  ;;  %v294_v18 = vld [vmem:[%s293_s13] sm:$0x1] }
 0x2b1   :  { %v284_v10 = vld [vmem:[#allocation4] sm:$0xf] }
 0x2b2   :  { %v285_v11 = vmul.f32 %v284_v10, %v284_v10 }
 0x2b4   :  { %v286_v12 = vsel %vm132_vm1, %v285_v11, 0.0 }
 0x2b5   :  { %287 = vadd.xlane.f32.xlu1 %v286_v12 }
 0x2c6   :  { %333 = vperm.xlu1 %568, %v323_v13  }
 0x33e   :  { %v288_v14 = vpop.xlane.xlu1 %287 }
 0x33f   :  { %v289_v15 = vmax.f32 %v288_v14, 1e-24 }
 0x341   :  { %575 = vrsqrt.f32 %v289_v15 }
 0x342   :  { %v334_v31 = vpop.permute.xlu1 %333 }
 0x34e   :  { %v576_v16 = vpop.eup %575 }
 0x34f   :  { %v291_v17 = vmul.f32 %v576_v16, %v284_v10 }
 0x351   :  { %v295_v19 = vadd.f32 %v294_v18, %v291_v17  ;;  %v301_v20 = vrot.slane %v291_v17, 1  ;;  %v308_v23 = vrot.slane %v291_v17, 2  ;;  %v315_v26 = vrot.slane %v291_v17, 3 }
 0x353   :  { %296 = vst.msk [vmem:[%s293_s13] sm:$0x1] %vm116_vm0, %v295_v19 }
 0x35a   :  { %v299_v21 = vld [vmem:[%s298_s15] sm:$0x1] }
 0x35b   :  { %v303_v22 = vadd.f32 %v301_v20, %v299_v21 }
 0x35d   :  { %304 = vst.msk [vmem:[%s298_s15] sm:$0x1] %vm116_vm0, %v303_v22 }
 0x364   :  { %v307_v24 = vld [vmem:[%s306_s4] sm:$0x1] }
 0x365   :  { %v310_v25 = vadd.f32 %v308_v23, %v307_v24 }
 0x367   :  { %311 = vst.msk [vmem:[%s306_s4] sm:$0x1] %vm116_vm0, %v310_v25 }
 0x36e   :  { %v314_v27 = vld [vmem:[%s313_s16] sm:$0x1] }
 0x36f   :  { %v317_v29 = vadd.f32 %v315_v26, %v314_v27 }
 0x371   :  { %318 = vst.msk [vmem:[%s313_s16] sm:$0x1] %vm116_vm0, %v317_v29 }
 0x378   :  { %v325_v33 = vld [vmem:[#allocation2 + $0x8] sm:$0x1]  ;;  %v324_v34 = vld [vmem:[#allocation2] sm:$0xff] }
 0x379   :  { %v337_v35 = vsel %vm321_vm2, %v334_v31, %v325_v33  ;;  %v336_v36 = vsel %vm321_vm2, %v329_v32, %v324_v34 }
 0x37a   :  { %651 = dma.done.wait [#allocation5], 512 }
 0x37b   :  { %652 = vsyncadd [#allocation5], 4294966784  ;;  %vm345_vm3 = vcmask 261120   ;;  %v344_v37 = vld [vmem:[#allocation3 + $0x18] sm:$0xff]  ;;  %v343_v38 = vld [vmem:[#allocation3 + $0x10] sm:$0xff]  ;;  %s659_s17 = smov [#allocation11]  }
 0x37c   :  { %557 = vmatprep.mubr.msk.f32.mxu0 %vm345_vm3, %v336_v36  ;;  %549 = vmatprep.subr.mxu0 %v344_v37  ;;  %v342_v39 = vld [vmem:[#allocation3 + $0x8] sm:$0xff]  ;;  %v341_v40 = vld [vmem:[#allocation3] sm:$0xff]  ;;  %s436_s18 = sshll.u32 %s659_s17, 4  ;;  %s437_s18 = int_to_ptr.vmem [resolvable:$true] %s436_s18 }
 0x37d   :  { %550 = vmatpush3.msra.mxu0 %v344_v37  ;;  %s625_s19 = scalar_lea.vmem %s437_s18, 256  ;;  %p630_p2 = scmp.lt.s32.totalorder %s437_s18, %s437_s18 }
 0x37e   :  { %551 = vmatprep.subr.mxu0 %v343_v38  ;;  %p626_p1 = scmp.ne.s32.totalorder %s437_s18, %s625_s19  ;;  %p631_p3 = scmp.lt.s32.totalorder %s625_s19, %s625_s19 }
 0x37f   :  { %552 = vmatpush3.msra.mxu0 %v343_v38 }
 0x380   :  { %553 = vmatprep.subr.mxu0 %v342_v39  ;;  %p632_p4 = por %p631_p3, %p630_p2 }
 0x381   :  { %554 = vmatpush3.msra.mxu0 %v342_v39 }
 0x382   :  { %555 = vmatprep.subr.mxu0 %v341_v40  ;;  %p633_p5 = pnand %p632_p4, %p626_p1 }
 0x383   :  { %556 = vmatpush3.msra.mxu0 %v341_v40 }
 0x384   :  { %558 = vmatmul.mubr.msk.f32.vlgmr.msra.gmra.mxu0 %vm345_vm3, %v337_v35 }
 0x444   :  { %v559_v41 = vpop.f32.mrf.mxu0 }
 0x445   :  { %577 = vtanh.f32 %v559_v41 }
 0x446   :  { %v418_v42 = vpop.f32.mrf.mxu0 }
 0x447   :  { %579 = vtanh.f32 %v418_v42 }
 0x452   :  { %v578_v43 = vpop.eup %577 }
 0x453   :  { %430 = vst [vmem:[#allocation11 + $0x8] sm:$0x1] %v578_v43 }
 0x454   :  { %v580_v44 = vpop.eup %579 }
 0x455   :  { %429 = vst [vmem:[#allocation11] sm:$0xff] %v580_v44 }
 0x456   :  { %636 = shalt.err (!%p633_p5)
}
 0x457   :  { %s660_s20 = smov 128   ;;  %s661_s21 = smov 8  }
 0x458   :  { %442 = dma.vmem_to_hbm [thread:$0]  %s437_s18, 256, %s757_s5, [#allocation7], %s660_s20, %s660_s20, %s661_s21  }
 0x459   :  { %653 = dma.done.wait [#allocation7], 256  }
 0x45a   :  { %654 = vsyncadd [#allocation7], 4294967040 }
 0x45b   :  { %446 = vsyncpa [#allocation7], 1 }
 0x45c   :  { %447 = vsyncpa [#allocation8], 1 }
 0x45d   :  { %448 = vsyncpa [#allocation10], 1 }
 0x45e   :  { %449 = vsyncmov [#allocation5] }
 0x461   :  { %s450_s24 = vpop.sfrf %449 }
 0x462   :  { %p541_p6 = scmp.ne.s32.totalorder %s450_s24, 0 }
 0x464   :  { %454 = shalt.err (%p541_p6)  }
 0x465   :  { %456 = vsyncmov [#allocation5 + $0x1] }
 0x468   :  { %s457_s25 = vpop.sfrf %456 }
 0x469   :  { %p542_p7 = scmp.ne.s32.totalorder %s457_s25, 0 }
 0x46b   :  { %461 = shalt.err (%p542_p7)  }

</bundles_post_ra>
